<compile_context>
chip_gen: v7x
topology: tpu7x:2x2x1
jax: 0.10.0
libtpu: 0.0.40
codegen_flags: <defaults>
</compile_context>

<pallas_src>
import functools

import jax
import jax.numpy as jnp
from jax.experimental import pallas as pl
from jax.experimental.pallas import tpu as pltpu

H1, H2 = 400, 300            # logical hidden dims of the module
H1P, H2P = 512, 384          # lane-padded (multiples of 128) versions
ACT_LANES = H1P - H2P        # 128: width of the narrow act tile
ACT_OFF = H1 - H2P           # 16: act's lane offset inside that tile
_SINGLE_STEP_ROWS = 2048     # rows per grid step cap (VMEM guard + megacore threshold)


def critic_kernel(obs_ref, act_ref, w1_ref, b1_ref, w2_ref, bias_ref,
                  wl_ref, bl_ref, out_ref):
    # Layer 1: relu(obs @ W1 + b1) -> [bB, 512] f32.  Padded cols [400:512] of
    # W1 and b1 are zero, so those lanes come out as exactly 0 after the ReLU.
    h1 = jnp.dot(obs_ref[...], w1_ref[...],
                 preferred_element_type=jnp.float32) + b1_ref[...]
    h1 = jnp.maximum(h1, 0.0)

    # Splice `act` into the zero lanes [400:512] of h1.  act_ref is a narrow
    # [bB, 128] bf16 tile whose lanes [16:16+n_act] hold act (16 = 400 - 384);
    # lanes [0:16] are zero so the valid h1 lanes [384:400] are untouched.
    x2_hi = h1[:, H2P:] + act_ref[...].astype(jnp.float32)
    x2 = jnp.concatenate([h1[:, :H2P], x2_hi], axis=-1).astype(jnp.bfloat16)

    # Layer 2 (fused, single K=512 matmul): relu(x2 @ [W2o ; W2a ; 0] + bias)
    # -> [bB, 384].  Padded bias lanes are zero so padded h2 lanes stay 0.
    h2 = jnp.dot(x2, w2_ref[...],
                 preferred_element_type=jnp.float32) + bias_ref[...]
    h2 = jnp.maximum(h2, 0.0)

    # Final N=1 projection on VPU + XLU (mul + cross-lane reduce) instead of a
    # 1-column MXU matmul; padded wl lanes are zero so they never contribute.
    out_ref[...] = (jnp.sum(h2 * wl_ref[...], axis=-1, keepdims=True)
                    + bl_ref[0, 0])


def _choose_block(B, block_b):
    """Pick (block_b, padded_B) per the perf review.

    * B <= 2048: one grid step -> weights fetched exactly once, zero per-step
      overhead (dominant regime on HBM-bound v5e/v6e).
    * B  > 2048: an even number of equal <=2048-row blocks so a 2-way megacore
      split on v7x never idles one core, and each block fits the 32 MiB
      scoped-VMEM default on every generation.
    """
    if block_b is None:
        if B <= _SINGLE_STEP_ROWS:
            return B, B
        n_blocks = 2 * pl.cdiv(B, 2 * _SINGLE_STEP_ROWS)
        block_b = pl.cdiv(B, n_blocks)
    block_b = min(block_b, _SINGLE_STEP_ROWS)          # VMEM guard
    if block_b != B:
        block_b = ((block_b + 7) // 8) * 8             # sublane-align blocks
    Bp = pl.cdiv(B, block_b) * block_b                 # pad instead of ragged fallback
    return block_b, Bp


@functools.partial(jax.jit, static_argnames=("block_b",))
def critic_forward(obs, act, kp, *, block_b=None):
    B, n_obs = obs.shape
    n_act = act.shape[1]
    assert n_act <= H1P - H1, "act must fit in the padded lanes of layer 1"

    block_b, Bp = _choose_block(B, block_b)
    grid = (Bp // block_b,)

    # obs as bf16 (halves the obs DMA); act as a narrow bf16 tile positioned at
    # lane offset 16 so the kernel's 128-aligned slice-add lands it on lanes
    # [400:400+n_act] of the layer-2 operand.  Zero-pad rows B:Bp if needed.
    obs_bf = obs.astype(jnp.bfloat16)
    if Bp != B:
        obs_bf = jnp.pad(obs_bf, ((0, Bp - B), (0, 0)))
    act_tile = (jnp.zeros((Bp, ACT_LANES), jnp.bfloat16)
                .at[:B, ACT_OFF:ACT_OFF + n_act].set(act.astype(jnp.bfloat16)))

    vmem = pltpu.MemorySpace.VMEM
    smem = pltpu.MemorySpace.SMEM
    const = lambda i: (0, 0)             # weights: same block every grid step

    in_specs = [
        pl.BlockSpec((block_b, n_obs), lambda i: (i, 0), memory_space=vmem),      # obs (bf16)
        pl.BlockSpec((block_b, ACT_LANES), lambda i: (i, 0), memory_space=vmem),  # act tile (bf16)
        pl.BlockSpec((n_obs, H1P), const, memory_space=vmem),                     # W1 (bf16)
        pl.BlockSpec((1, H1P), const, memory_space=vmem),                         # b1 (f32)
        pl.BlockSpec((H1P, H2P), const, memory_space=vmem),                       # W2 (bf16, fused)
        pl.BlockSpec((1, H2P), const, memory_space=vmem),                         # bias (f32)
        pl.BlockSpec((1, H2P), const, memory_space=vmem),                         # wl row (f32)
        pl.BlockSpec((1, 1), const, memory_space=smem),                           # bl scalar
    ]
    out_spec = pl.BlockSpec((block_b, 1), lambda i: (i, 0), memory_space=vmem)

    cost = pl.CostEstimate(
        flops=2 * Bp * (n_obs * H1P + H1P * H2P + H2P),
        transcendentals=0,
        bytes_accessed=(Bp * n_obs * 2                      # obs (bf16)
                        + Bp * ACT_LANES * 2                # act tile (bf16)
                        + Bp * 4                            # output
                        + n_obs * H1P * 2 + H1P * H2P * 2   # bf16 weights
                        + (H1P + 2 * H2P + 1) * 4),         # f32 b1 / bias / wl / bl
    )

    out = pl.pallas_call(
        critic_kernel,
        out_shape=jax.ShapeDtypeStruct((Bp, 1), jnp.float32),
        grid_spec=pltpu.PrefetchScalarGridSpec(
            num_scalar_prefetch=0,
            grid=grid,
            in_specs=in_specs,
            out_specs=out_spec,
        ),
        compiler_params=pltpu.CompilerParams(
            dimension_semantics=("parallel",)),
        cost_estimate=cost,
    )(obs_bf, act_tile, kp["w1"], kp["b1"], kp["w2"], kp["bias"],
      kp["wl"], kp["bl"])

    return out[:B] if Bp != B else out


def init_params(key, n_obs, n_actions):
    """f32 parameters matching the PyTorch module (W stored as [in, out]).

    nn.Linear default init is U(-1/sqrt(fan_in), 1/sqrt(fan_in)); `last` is
    U(-3e-3, 3e-3); the `bias` parameter is ones([300]).
    """
    ks = jax.random.split(key, 6)

    def unif(k, shape, bound):
        return jax.random.uniform(k, shape, jnp.float32, -bound, bound)

    lim1 = 1.0 / float(n_obs) ** 0.5
    lim2o = 1.0 / float(H1) ** 0.5
    lim2a = 1.0 / float(n_actions) ** 0.5
    lim_last = 3 * 0.001

    return {
        "w1":  unif(ks[0], (n_obs, H1), lim1),
        "b1":  unif(ks[1], (1, H1), lim1),
        "w2o": unif(ks[2], (H1, H2), lim2o),
        "w2a": unif(ks[3], (n_actions, H2), lim2a),
        "bias": jnp.ones((1, H2), jnp.float32),     # nn.Parameter(torch.ones([300]))
        "wl":  unif(ks[4], (H2, 1), lim_last),
        "bl":  unif(ks[5], (1, 1), lim_last),
    }


def prepare_kernel_params(p, n_obs, n_actions):
    """Lane-pad + bf16-cast parameters for the kernel.

    * W1 -> [n_obs, 512] bf16, b1 -> [1, 512] f32 (cols 400: are zero, so the
      h1 lanes act is spliced into are exactly zero).
    * W2 -> [512, 384] bf16: rows 0:400 = W2o, rows 400:400+n_act = W2a
      (matches the act-spliced layer-2 operand); other rows/cols zero.
    * bias -> [1, 384] f32 (padded lanes zero so ReLU keeps them at 0).
    * last layer as a [1, 384] f32 row (VPU/XLU reduce) + (1,1) f32 SMEM scalar.

    Keep this padded pytree out of the optimizer: the act-splice trick requires
    the padded lanes of W1/b1 to stay exactly zero.
    """
    assert n_actions <= H1P - H1, "act must fit in the padded lanes of layer 1"
    w1p = jnp.zeros((n_obs, H1P), jnp.float32).at[:, :H1].set(p["w1"])
    b1p = jnp.zeros((1, H1P), jnp.float32).at[:, :H1].set(p["b1"])
    w2p = (jnp.zeros((H1P, H2P), jnp.float32)
           .at[:H1, :H2].set(p["w2o"])
           .at[H1:H1 + n_actions, :H2].set(p["w2a"]))
    biasp = jnp.zeros((1, H2P), jnp.float32).at[:, :H2].set(p["bias"])
    wlp = jnp.zeros((1, H2P), jnp.float32).at[0, :H2].set(p["wl"][:, 0])
    return {
        "w1": w1p.astype(jnp.bfloat16),
        "b1": b1p,
        "w2": w2p.astype(jnp.bfloat16),
        "bias": biasp,
        "wl": wlp,
        "bl": p["bl"].astype(jnp.float32),
    }


def critic_reference(obs, act, p):
    """Exact f32 reference of the module's bn=False forward."""
    h1 = jnp.maximum(obs @ p["w1"] + p["b1"], 0.0)
    h2 = jnp.maximum(h1 @ p["w2o"] + act @ p["w2a"] + p["bias"], 0.0)
    return h2 @ p["wl"] + p["bl"]


def critic_reference_bf16(obs, act, p):
    """Reference emulating the kernel's bf16-input / f32-accumulate numerics."""
    bf = jnp.bfloat16
    h1 = jnp.maximum(
        jnp.dot(obs.astype(bf), p["w1"].astype(bf),
                preferred_element_type=jnp.float32) + p["b1"], 0.0)
    h2 = jnp.maximum(
        jnp.dot(h1.astype(bf), p["w2o"].astype(bf),
                preferred_element_type=jnp.float32)
        + jnp.dot(act.astype(bf), p["w2a"].astype(bf),
                  preferred_element_type=jnp.float32)
        + p["bias"], 0.0)
    # Mirror the kernel's f32 VPU mul + cross-lane sum for the last layer.
    return jnp.sum(h2 * p["wl"][:, 0][None, :], axis=-1, keepdims=True) + p["bl"]


if __name__ == "__main__":
    B, n_obs, n_actions = 8, 32, 8

    key = jax.random.PRNGKey(0)
    k_obs, k_act, k_param = jax.random.split(key, 3)

    obs = jax.random.normal(k_obs, (B, n_obs), jnp.float32)
    act = jax.random.normal(k_act, (B, n_actions), jnp.float32)
    params = init_params(k_param, n_obs, n_actions)
    kparams = prepare_kernel_params(params, n_obs, n_actions)

    out = critic_forward(obs, act, kparams)
    out = jax.block_until_ready(out)
    assert out.shape == (B, 1)

    # Tight check vs a reference that emulates the kernel's bf16/f32 numerics
    # (validates lane padding / narrow-act splice / fused-W2 construction).
    ref_bf16 = critic_reference_bf16(obs, act, params)
    assert jnp.allclose(out, ref_bf16, atol=1e-4, rtol=1e-3), \
        "mismatch vs bf16-emulating reference"

    # Loose check vs the exact f32 module forward (differences are only bf16
    # weight/activation rounding inside the matmuls).
    ref_f32 = critic_reference(obs, act, params)
    assert jnp.allclose(out, ref_f32, atol=5e-3, rtol=5e-2), \
        "mismatch vs f32 reference"

    # Exercise the multi-block + batch-padding path (explicit small block_b).
    B2 = 200
    k2o, k2a = jax.random.split(jax.random.PRNGKey(1))
    obs2 = jax.random.normal(k2o, (B2, n_obs), jnp.float32)
    act2 = jax.random.normal(k2a, (B2, n_actions), jnp.float32)
    out2 = jax.block_until_ready(critic_forward(obs2, act2, kparams, block_b=64))
    assert out2.shape == (B2, 1)
    assert jnp.allclose(out2, critic_reference_bf16(obs2, act2, params),
                        atol=1e-4, rtol=1e-3), "multi-block mismatch"

    print("KERNEL_OK")
</pallas_src>

<mosaic_0001>
module attributes {stable_mosaic.version = 11 : i64} {
  func.func @critic_kernel(%arg0: i32, %arg1: memref<8x32xbf16, #tpu.memory_space<vmem>>, %arg2: memref<8x128xbf16, #tpu.memory_space<vmem>>, %arg3: memref<32x512xbf16, #tpu.memory_space<vmem>>, %arg4: memref<1x512xf32, #tpu.memory_space<vmem>>, %arg5: memref<512x384xbf16, #tpu.memory_space<vmem>>, %arg6: memref<1x384xf32, #tpu.memory_space<vmem>>, %arg7: memref<1x384xf32, #tpu.memory_space<vmem>>, %arg8: memref<1x1xf32, #tpu.memory_space<smem>>, %arg9: memref<8x1xf32, #tpu.memory_space<vmem>>) attributes {dimension_semantics = [#tpu.dimension_semantics<parallel>], iteration_bounds = array<i64: 1>, scalar_prefetch = 0 : i64, scratch_operands = 0 : i64, tpu.core_type = #tpu.core_type<tc>, window_params = [{transform_indices = @transform_0, window_bounds = array<i64: 8, 32>}, {transform_indices = @transform_1, window_bounds = array<i64: 8, 128>}, {pipeline_mode = #tpu.pipeline_mode<synchronous>, transform_indices = @transform_2, window_bounds = array<i64: 32, 512>}, {pipeline_mode = #tpu.pipeline_mode<synchronous>, transform_indices = @transform_3, window_bounds = array<i64: 1, 512>}, {pipeline_mode = #tpu.pipeline_mode<synchronous>, transform_indices = @transform_4, window_bounds = array<i64: 512, 384>}, {pipeline_mode = #tpu.pipeline_mode<synchronous>, transform_indices = @transform_5, window_bounds = array<i64: 1, 384>}, {pipeline_mode = #tpu.pipeline_mode<synchronous>, transform_indices = @transform_6, window_bounds = array<i64: 1, 384>}, {transform_indices = @transform_7, window_bounds = array<i64: 1, 1>}, {transform_indices = @transform_8, window_bounds = array<i64: 8, 1>}]} {
    %c0 = arith.constant 0 : index
    %c0_0 = arith.constant 0 : index
    %0 = vector.load %arg1[%c0, %c0_0] : memref<8x32xbf16, #tpu.memory_space<vmem>>, vector<8x32xbf16>
    %c0_1 = arith.constant 0 : index
    %c0_2 = arith.constant 0 : index
    %1 = vector.load %arg3[%c0_1, %c0_2] : memref<32x512xbf16, #tpu.memory_space<vmem>>, vector<32x512xbf16>
    %cst = arith.constant dense<0.000000e+00> : vector<8x512xf32>
    %2 = tpu.matmul %0, %1, %cst {dimension_numbers = #tpu.dot_dimension_numbers<[1], [0], [0], [1], [0, 0, 1, 1], [], []>} : vector<8x32xbf16>, vector<32x512xbf16>, vector<8x512xf32> -> vector<8x512xf32>
    %c0_3 = arith.constant 0 : index
    %c0_4 = arith.constant 0 : index
    %3 = vector.load %arg4[%c0_3, %c0_4] : memref<1x512xf32, #tpu.memory_space<vmem>>, vector<1x512xf32>
    %4 = vector.broadcast %3 : vector<1x512xf32> to vector<8x512xf32>
    %5 = arith.addf %2, %4 : vector<8x512xf32>
    %cst_5 = arith.constant 0.000000e+00 : f32
    %6 = vector.broadcast %cst_5 : f32 to vector<8x512xf32>
    %7 = arith.maximumf %5, %6 : vector<8x512xf32>
    %8 = vector.extract_strided_slice %7 {offsets = [0, 384], sizes = [8, 128], strides = [1, 1]} : vector<8x512xf32> to vector<8x128xf32>
    %c0_6 = arith.constant 0 : index
    %c0_7 = arith.constant 0 : index
    %9 = vector.load %arg2[%c0_6, %c0_7] : memref<8x128xbf16, #tpu.memory_space<vmem>>, vector<8x128xbf16>
    %10 = arith.extf %9 : vector<8x128xbf16> to vector<8x128xf32>
    %11 = arith.addf %8, %10 : vector<8x128xf32>
    %12 = vector.extract_strided_slice %7 {offsets = [0, 0], sizes = [8, 384], strides = [1, 1]} : vector<8x512xf32> to vector<8x384xf32>
    %13 = tpu.concatenate %12, %11 in 1 : vector<8x384xf32>, vector<8x128xf32> -> vector<8x512xf32>
    %14 = arith.truncf %13 : vector<8x512xf32> to vector<8x512xbf16>
    %c0_8 = arith.constant 0 : index
    %c0_9 = arith.constant 0 : index
    %15 = vector.load %arg5[%c0_8, %c0_9] : memref<512x384xbf16, #tpu.memory_space<vmem>>, vector<512x384xbf16>
    %cst_10 = arith.constant dense<0.000000e+00> : vector<8x384xf32>
    %16 = tpu.matmul %14, %15, %cst_10 {dimension_numbers = #tpu.dot_dimension_numbers<[1], [0], [0], [1], [0, 0, 1, 1], [], []>} : vector<8x512xbf16>, vector<512x384xbf16>, vector<8x384xf32> -> vector<8x384xf32>
    %c0_11 = arith.constant 0 : index
    %c0_12 = arith.constant 0 : index
    %17 = vector.load %arg6[%c0_11, %c0_12] : memref<1x384xf32, #tpu.memory_space<vmem>>, vector<1x384xf32>
    %18 = vector.broadcast %17 : vector<1x384xf32> to vector<8x384xf32>
    %19 = arith.addf %16, %18 : vector<8x384xf32>
    %cst_13 = arith.constant 0.000000e+00 : f32
    %20 = vector.broadcast %cst_13 : f32 to vector<8x384xf32>
    %21 = arith.maximumf %19, %20 : vector<8x384xf32>
    %c0_14 = arith.constant 0 : index
    %c0_15 = arith.constant 0 : index
    %22 = vector.load %arg7[%c0_14, %c0_15] : memref<1x384xf32, #tpu.memory_space<vmem>>, vector<1x384xf32>
    %23 = vector.broadcast %22 : vector<1x384xf32> to vector<8x384xf32>
    %24 = arith.mulf %21, %23 : vector<8x384xf32>
    %cst_16 = arith.constant dense<0.000000e+00> : vector<8xf32>
    %25 = vector.multi_reduction <add>, %24, %cst_16 [1] : vector<8x384xf32> to vector<8xf32>
    %26 = vector.shape_cast %25 : vector<8xf32> to vector<8x1xf32>
    %c0_17 = arith.constant 0 : index
    %c0_18 = arith.constant 0 : index
    %27 = memref.load %arg8[%c0_17, %c0_18] : memref<1x1xf32, #tpu.memory_space<smem>>
    %28 = vector.broadcast %27 : f32 to vector<8x1xf32>
    %29 = arith.addf %26, %28 : vector<8x1xf32>
    %c0_19 = arith.constant 0 : index
    %c0_20 = arith.constant 0 : index
    %30 = vector.load %arg9[%c0_19, %c0_20] : memref<8x1xf32, #tpu.memory_space<vmem>>, vector<8x1xf32>
    tpu.vector_store %arg9[%c0_19, %c0_20], %29 {strides = array<i32>} : memref<8x1xf32, #tpu.memory_space<vmem>>, vector<8x1xf32>,
    return
  }
  func.func @transform_0(%arg0: i32) -> (i32, i32) {
    %c0_i32 = arith.constant 0 : i32
    %c0_i32_0 = arith.constant 0 : i32
    return %arg0, %c0_i32 : i32, i32
  }
  func.func @transform_1(%arg0: i32) -> (i32, i32) {
    %c0_i32 = arith.constant 0 : i32
    %c0_i32_0 = arith.constant 0 : i32
    return %arg0, %c0_i32 : i32, i32
  }
  func.func @transform_2(%arg0: i32) -> (i32, i32) {
    %c0_i32 = arith.constant 0 : i32
    %c0_i32_0 = arith.constant 0 : i32
    %c0_i32_1 = arith.constant 0 : i32
    return %c0_i32, %c0_i32_0 : i32, i32
  }
  func.func @transform_3(%arg0: i32) -> (i32, i32) {
    %c0_i32 = arith.constant 0 : i32
    %c0_i32_0 = arith.constant 0 : i32
    %c0_i32_1 = arith.constant 0 : i32
    return %c0_i32, %c0_i32_0 : i32, i32
  }
  func.func @transform_4(%arg0: i32) -> (i32, i32) {
    %c0_i32 = arith.constant 0 : i32
    %c0_i32_0 = arith.constant 0 : i32
    %c0_i32_1 = arith.constant 0 : i32
    return %c0_i32, %c0_i32_0 : i32, i32
  }
  func.func @transform_5(%arg0: i32) -> (i32, i32) {
    %c0_i32 = arith.constant 0 : i32
    %c0_i32_0 = arith.constant 0 : i32
    %c0_i32_1 = arith.constant 0 : i32
    return %c0_i32, %c0_i32_0 : i32, i32
  }
  func.func @transform_6(%arg0: i32) -> (i32, i32) {
    %c0_i32 = arith.constant 0 : i32
    %c0_i32_0 = arith.constant 0 : i32
    %c0_i32_1 = arith.constant 0 : i32
    return %c0_i32, %c0_i32_0 : i32, i32
  }
  func.func @transform_7(%arg0: i32) -> (i32, i32) {
    %c0_i32 = arith.constant 0 : i32
    %c0_i32_0 = arith.constant 0 : i32
    %c0_i32_1 = arith.constant 0 : i32
    return %c0_i32, %c0_i32_0 : i32, i32
  }
  func.func @transform_8(%arg0: i32) -> (i32, i32) {
    %c0_i32 = arith.constant 0 : i32
    %c0_i32_0 = arith.constant 0 : i32
    return %arg0, %c0_i32 : i32, i32
  }
}

</mosaic_0001>

<bundles_post_ra>
// kernel: critic_forward.1
= control target key start
LH: loop header
LB: loop body
LE: loop exit
PB: predicated region body
PF: predicated region fallthrough
CT: control target
= control target key end

     0   :  { %14 = vsyncpa [#allocation4], 0  ;;  %s1555_s0 = inlined_call_operand.vmem [shape: bf16[8,32], index: 0, kind: input, shape index: {}]   ;;  %s1556_s1 = inlined_call_operand.vmem [shape: bf16[8,128], index: 1, kind: input, shape index: {}]   ;;  %s1557_s2 = inlined_call_operand.hbm [shape: bf16[32,512], index: 2, kind: input, shape index: {}]   ;;  %s1558_s3 = inlined_call_operand.vmem [shape: f32[1,512], index: 3, kind: input, shape index: {}]   ;;  %s1559_s4 = inlined_call_operand.hbm [shape: bf16[512,384], index: 4, kind: input, shape index: {}]   ;;  %s1560_s5 = inlined_call_operand.vmem [shape: f32[1,384], index: 5, kind: input, shape index: {}]   ;;  %s1561_s6 = inlined_call_operand.vmem [shape: f32[1,384], index: 6, kind: input, shape index: {}]   ;;  %s1562_s7 = inlined_call_operand.<no memory space> [shape: f32[1,1], index: 7, kind: input, shape index: {}]   ;;  %s1563_s8 = inlined_call_operand.vmem [shape: f32[8,1], index: 8, kind: output, shape index: {}]  }
   0x1   :  { %15 = vsyncpa [#allocation6], 0  ;;  %s1435_s27 = smov [#allocation3]   ;;  %s1387_s9 = scalar_lea.hbm %s1557_s2, 1024 }
   0x2   :  { %s25_s28 = sshll.u32 %s1435_s27, 4  ;;  %p1388_p0 = scmp.ne.s32.totalorder %s1557_s2, %s1387_s9  ;;  %s26_s28 = int_to_ptr.vmem [resolvable:$true] %s25_s28 }
   0x3   :  { %p1391_p1 = scmp.lt.u32.totalorder %s1387_s9, %s1557_s2 }
   0x5   :  { %p1393_p2 = pnand %p1391_p1, %p1388_p0 }
   0x7   :  { %1396 = shalt.err (!%p1393_p2)
}
   0x8   :  { %s1397_s14 = scalar_lea.vmem %s26_s28, 1024  ;;  %p1402_p4 = scmp.lt.s32.totalorder %s26_s28, %s26_s28 }
   0x9   :  { %p1398_p3 = scmp.ne.s32.totalorder %s26_s28, %s1397_s14  ;;  %p1403_p5 = scmp.lt.s32.totalorder %s1397_s14, %s1397_s14 }
   0xb   :  { %p1404_p6 = por %p1403_p5, %p1402_p4 }
   0xd   :  { %p1405_p7 = pnand %p1404_p6, %p1398_p3 }
   0xf   :  { %1408 = shalt.err (!%p1405_p7)
}
  0x10   :  { %s1436_s15 = smov 256   ;;  %s1437_s16 = smov 16  }
  0x11   :  { %31 = dma.hbm_to_vmem [thread:$0]  %s1557_s2, 1024, %s26_s28, [#allocation4], %s1436_s15, %s1436_s15, %s1437_s16  }
  0x12   :  { %s1438_s19 = smov [#allocation5]   ;;  %s1409_s23 = scalar_lea.hbm %s1559_s4, 12288 }
  0x13   :  { %s39_s20 = sshll.u32 %s1438_s19, 4  ;;  %p1410_p8 = scmp.ne.s32.totalorder %s1559_s4, %s1409_s23  ;;  %s40_s20 = int_to_ptr.vmem [resolvable:$true] %s39_s20 }
  0x14   :  { %p1413_p9 = scmp.lt.u32.totalorder %s1409_s23, %s1559_s4 }
  0x16   :  { %p1415_p10 = pnand %p1413_p9, %p1410_p8 }
  0x18   :  { %1418 = shalt.err (!%p1415_p10)
}
  0x19   :  { %s1419_s29 = scalar_lea.vmem %s40_s20, 12288  ;;  %p1424_p12 = scmp.lt.s32.totalorder %s40_s20, %s40_s20 }
  0x1a   :  { %p1420_p11 = scmp.ne.s32.totalorder %s40_s20, %s1419_s29  ;;  %p1425_p13 = scmp.lt.s32.totalorder %s1419_s29, %s1419_s29 }
  0x1c   :  { %p1426_p0 = por %p1425_p13, %p1424_p12 }
  0x1e   :  { %p1427_p1 = pnand %p1426_p0, %p1420_p11 }
  0x20   :  { %1430 = shalt.err (!%p1427_p1)
}
  0x21   :  { %s1439_s2 = smov 192   ;;  %s1440_s28 = smov 12  }
  0x22   :  { %45 = dma.hbm_to_vmem [thread:$0]  %s1559_s4, 12288, %s40_s20, [#allocation6], %s1439_s2, %s1439_s2, %s1440_s28  }
  0x23   :  { %1431 = dma.done.wait [#allocation4], 1024  }
  0x24   :  { %1432 = vsyncadd [#allocation4], 4294966272 }
  0x25   :  { %1433 = dma.done.wait [#allocation6], 12288  }
  0x26   :  { %1434 = vsyncadd [#allocation6], 4294955008  ;;  %v1441_v0 = vmov 0   ;;  %v1247_v1 = vld [vmem:[#allocation3 + $0x4] ss:$16 sps:$4 sm:$0xff]   ;;  %vm130_vm0 = vcmask 261120   ;;  %v70_v60 = vlaneseq }
  0x27   :  { %166 = vmatprep.mubr.bf16.mxu1 %v1441_v0  ;;  %v1249_v2 = vld [vmem:[#allocation3] ss:$16 sps:$4 sm:$0xff]   ;;  %134 = vmatprep.subr.bf16.mxu1 %v1247_v1  ;;  %v1250_v3 = vld [vmem:[#allocation3 + $0x24] ss:$16 sps:$4 sm:$0xff]   ;;  %v1255_v5 = vld [vmem:[#allocation3 + $0xc] ss:$16 sps:$4 sm:$0xff]  }
  0x28   :  { %135 = vmatpush1.bf16.msra.mxu1 %v1249_v2  ;;  %v1252_v4 = vld [vmem:[#allocation3 + $0x20] ss:$16 sps:$4 sm:$0xff]   ;;  %v1253_v7 = vld [vmem:[#allocation3 + $0x8] ss:$16 sps:$4 sm:$0xff]   ;;  %v1258_v11 = vld [vmem:[#allocation3 + $0x2c] ss:$16 sps:$4 sm:$0xff]  }
  0x29   :  { %136 = vmatprep.subr.bf16.mxu1 %v1250_v3  ;;  %v59_v6 = vld [vmem:[%s1555_s0] sm:$0xf]  ;;  %v1259_v8 = vld [vmem:[#allocation5 + $0x4] ss:$12 sps:$4 sm:$0xff]   ;;  %v1262_v10 = vld [vmem:[#allocation5 + $0x1c] ss:$12 sps:$4 sm:$0xff]  }
  0x2a   :  { %v1261_v9 = vld [vmem:[#allocation5] ss:$12 sps:$4 sm:$0xff]   ;;  %884 = vmatprep.subr.bf16.mxu0 %v1259_v8  ;;  %v1264_v12 = vld [vmem:[#allocation5 + $0x18] ss:$12 sps:$4 sm:$0xff]   ;;  %v1267_v15 = vld [vmem:[#allocation5 + $0x30] ss:$12 sps:$4 sm:$0xff]  }
  0x2b   :  { %885 = vmatpush1.bf16.msra.mxu0 %v1261_v9  ;;  %v1265_v13 = vld [vmem:[#allocation5 + $0x34] ss:$12 sps:$4 sm:$0xff]   ;;  %v1256_v14 = vld [vmem:[#allocation3 + $0x28] ss:$16 sps:$4 sm:$0xff]   ;;  %v1271_v18 = vld [vmem:[#allocation5 + $0x64] ss:$12 sps:$4 sm:$0xff]  }
  0x2c   :  { %137 = vmatpush1.bf16.msra.mxu1 %v1252_v4  ;;  %886 = vmatprep.subr.bf16.mxu0 %v1262_v10  ;;  %v1268_v16 = vld [vmem:[#allocation5 + $0x4c] ss:$12 sps:$4 sm:$0xff]   ;;  %v1270_v17 = vld [vmem:[#allocation5 + $0x48] ss:$12 sps:$4 sm:$0xff]   ;;  %v1279_v29 = vld [vmem:[#allocation5 + $0x90] ss:$12 sps:$4 sm:$0xff]  }
  0x2d   :  { %175 = vmatprep.subr.bf16.mxu1 %v1255_v5  ;;  %v1285_v19 = vld [vmem:[#allocation5 + $0xc8] ss:$12 sps:$4 sm:$0xff]   ;;  %v1273_v21 = vld [vmem:[#allocation5 + $0x60] ss:$12 sps:$4 sm:$0xff]   ;;  %v1276_v25 = vld [vmem:[#allocation5 + $0x78] ss:$12 sps:$4 sm:$0xff]  }
  0x2e   :  { %v1287_v20 = vld [vmem:[#allocation5 + $0x8] ss:$12 sps:$4 sm:$0xff]   ;;  %v1290_v23 = vld [vmem:[#allocation5 + $0xe0] ss:$12 sps:$4 sm:$0xff]   ;;  %v1295_v26 = vld [vmem:[#allocation5 + $0xf8] ss:$12 sps:$4 sm:$0xff]  }
  0x2f   :  { %1092 = vmatmul.mubr.msk.bf16.vlgmr.msra.gmra.mrb[0].mxu1 %vm130_vm0, %v59_v6  ;;  %887 = vmatpush1.bf16.msra.mxu0 %v1264_v12  ;;  %v1274_v22 = vld [vmem:[#allocation5 + $0x7c] ss:$12 sps:$4 sm:$0xff]   ;;  %v1292_v24 = vld [vmem:[#allocation5 + $0x20] ss:$12 sps:$4 sm:$0xff]   ;;  %v1297_v28 = vld [vmem:[#allocation5 + $0x38] ss:$12 sps:$4 sm:$0xff]  }
  0x30   :  { %176 = vmatpush1.bf16.msra.mxu1 %v1253_v7  ;;  %207 = vmatprep.mubr.bf16.mxu1 %v1441_v0  ;;  %v1277_v27 = vld [vmem:[#allocation5 + $0x94] ss:$12 sps:$4 sm:$0xff]   ;;  %v1300_v30 = vld [vmem:[#allocation5 + $0x110] ss:$12 sps:$4 sm:$0xff]   ;;  %v1280_v32 = vld [vmem:[#allocation5 + $0xac] ss:$12 sps:$4 sm:$0xff]  }
  0x31   :  { %177 = vmatprep.subr.bf16.mxu1 %v1258_v11  ;;  %888 = vmatprep.subr.bf16.mxu0 %v1265_v13  ;;  %v1302_v31 = vld [vmem:[#allocation5 + $0x50] ss:$12 sps:$4 sm:$0xff]   ;;  %v1282_v33 = vld [vmem:[#allocation5 + $0xa8] ss:$12 sps:$4 sm:$0xff]   ;;  %v1310_v37 = vld [vmem:[#allocation5 + $0x140] ss:$12 sps:$4 sm:$0xff]  }
  0x32   :  { %v1305_v34 = vld [vmem:[#allocation5 + $0x128] ss:$12 sps:$4 sm:$0xff]   ;;  %v1283_v35 = vld [vmem:[#allocation5 + $0xc4] ss:$12 sps:$4 sm:$0xff]   ;;  %v1286_v38 = vld [vmem:[#allocation5 + $0xc0] ss:$12 sps:$4 sm:$0xff]  }
  0x33   :  { %889 = vmatpush1.bf16.msra.mxu0 %v1267_v15  ;;  %v1307_v36 = vld [vmem:[#allocation5 + $0x68] ss:$12 sps:$4 sm:$0xff]   ;;  %v1312_v40 = vld [vmem:[#allocation5 + $0x80] ss:$12 sps:$4 sm:$0xff]   ;;  %v1291_v41 = vld [vmem:[#allocation5 + $0xd8] ss:$12 sps:$4 sm:$0xff]  }
  0x34   :  { %178 = vmatpush1.bf16.msra.mxu1 %v1256_v14  ;;  %890 = vmatprep.subr.bf16.mxu0 %v1268_v16  ;;  %v1288_v39 = vld [vmem:[#allocation5 + $0xdc] ss:$12 sps:$4 sm:$0xff]   ;;  %v1293_v42 = vld [vmem:[#allocation5 + $0xf4] ss:$12 sps:$4 sm:$0xff]   ;;  %v1298_v44 = vld [vmem:[#allocation5 + $0x10c] ss:$12 sps:$4 sm:$0xff]  }
  0x35   :  { %1190 = vmatprep.subr.bf16.mxu1 %v1285_v19  ;;  %v1296_v43 = vld [vmem:[#allocation5 + $0xf0] ss:$12 sps:$4 sm:$0xff]   ;;  %v1301_v45 = vld [vmem:[#allocation5 + $0x108] ss:$12 sps:$4 sm:$0xff]   ;;  %v1306_v47 = vld [vmem:[#allocation5 + $0x120] ss:$12 sps:$4 sm:$0xff]  }
  0x36   :  { %v1303_v46 = vld [vmem:[#allocation5 + $0x124] ss:$12 sps:$4 sm:$0xff]   ;;  %v1308_v48 = vld [vmem:[#allocation5 + $0x13c] ss:$12 sps:$4 sm:$0xff]   ;;  %v1313_v50 = vld [vmem:[#allocation5 + $0x154] ss:$12 sps:$4 sm:$0xff]  }
  0x37   :  { %1093 = vmatmul.mubr.msk.bf16.vlgmr.msra.gmra.mrb[4].mxu1 %vm130_vm0, %v59_v6  ;;  %891 = vmatpush1.bf16.msra.mxu0 %v1270_v17  ;;  %v1311_v49 = vld [vmem:[#allocation5 + $0x138] ss:$12 sps:$4 sm:$0xff]   ;;  %v1316_v52 = vld [vmem:[#allocation5 + $0x150] ss:$12 sps:$4 sm:$0xff]   ;;  %v1321_v56 = vld [vmem:[#allocation5 + $0x168] ss:$12 sps:$4 sm:$0xff]  }
  0x38   :  { %1191 = vmatpush3.bf16.msra.mxu1 %v1287_v20  ;;  %892 = vmatprep.subr.bf16.mxu0 %v1271_v18  ;;  %v1315_v51 = vld [vmem:[#allocation5 + $0x158] ss:$12 sps:$4 sm:$0xff]   ;;  %v1320_v55 = vld [vmem:[#allocation5 + $0x170] ss:$12 sps:$4 sm:$0xff]   ;;  %v1326_v59 = vld [vmem:[#allocation5 + $0x248] ss:$12 sps:$4 sm:$0xff]  }
  0x39   :  { %1192 = vmatprep.subr.bf16.mxu1 %v1290_v23  ;;  %v1317_v53 = vld [vmem:[#allocation5 + $0x98] ss:$12 sps:$4 sm:$0xff]   ;;  %v1322_v57 = vld [vmem:[#allocation5 + $0xb0] ss:$12 sps:$4 sm:$0xff]   ;;  %v71_v61 = vshrl.u32 %v70_v60, 7  ;;  %vm1076_vm1 = vcmask 7168  }
  0x3a   :  { %v1318_v54 = vld [vmem:[#allocation5 + $0x16c] ss:$12 sps:$4 sm:$0xff]   ;;  %v1325_v58 = vld [vmem:[#allocation5 + $0x184] ss:$12 sps:$4 sm:$0xff]   ;;  %v1521_v63 = vld [vmem:[%s1558_s3] sm:$0xf] }
  0x3b   :  { %893 = vmatpush1.bf16.msra.mxu0 %v1273_v21  ;;  %v1516_v62 = vsub.s32 0, %v71_v61  ;;  %v1523_v0 = vsub.s32 1, %v71_v61  ;;  %v84_v8 = vsub.s32 3, %v71_v61  ;;  %v1323_v13 = vld [vmem:[#allocation5 + $0x180] ss:$12 sps:$4 sm:$0xff]  }
  0x3c   :  { %1193 = vmatpush3.bf16.msra.mxu1 %v1292_v24  ;;  %894 = vmatprep.subr.bf16.mxu0 %v1274_v22  ;;  %v1327_v14 = vld [vmem:[#allocation5 + $0x188] ss:$12 sps:$4 sm:$0xff]   ;;  %v1331_v18 = vld [vmem:[#allocation5 + $0x260] ss:$12 sps:$4 sm:$0xff]   ;;  %v1328_v22 = vld [vmem:[#allocation5 + $0x198] ss:$12 sps:$4 sm:$0xff]  }
  0x3d   :  { %1194 = vmatprep.subr.bf16.mxu1 %v1295_v26  ;;  %v73_v1 = vrot.slane %v1521_v63, %v1516_v62  ;;  %v77_v2 = vrot.slane %v1521_v63, %v1523_v0  ;;  %v85_v15 = vrot.slane %v1521_v63, %v84_v8  ;;  %v1330_v17 = vld [vmem:[#allocation5 + $0x19c] ss:$12 sps:$4 sm:$0xff]   ;;  %v220_v19 = vld [vmem:[%s1556_s1] sm:$0xf] }
  0x3e   :  { %v1332_v23 = vld [vmem:[#allocation5 + $0x1a0] ss:$12 sps:$4 sm:$0xff]   ;;  %v1380_v8 = vld [vmem:[#allocation5 + $0x2bc] ss:$12 sps:$4 sm:$0xff]  }
  0x3f   :  { %895 = vmatpush1.bf16.msra.mxu0 %v1276_v25  ;;  %v221_v25 = vunpack.c.l.bf16 %v220_v19  ;;  %v355_v19 = vld [vmem:[%s1560_s5] sm:$0x7] }
  0x40   :  { %1195 = vmatpush3.bf16.msra.mxu1 %v1297_v28  ;;  %896 = vmatprep.subr.bf16.mxu0 %v1277_v27  ;;  %v1335_v27 = vld [vmem:[#allocation5 + $0x1b4] ss:$12 sps:$4 sm:$0xff]   ;;  %v1336_v28 = vld [vmem:[#allocation5 + $0x278] ss:$12 sps:$4 sm:$0xff]  }
  0x41   :  { %1196 = vmatprep.subr.bf16.mxu1 %v1300_v30 }
  0x43   :  { %897 = vmatpush1.bf16.msra.mxu0 %v1279_v29 }
  0x44   :  { %1197 = vmatpush3.bf16.msra.mxu1 %v1302_v31  ;;  %898 = vmatprep.subr.bf16.mxu0 %v1280_v32  ;;  %v1333_v31 = vld [vmem:[#allocation5 + $0x1b0] ss:$12 sps:$4 sm:$0xff]   ;;  %v1337_v32 = vld [vmem:[#allocation5 + $0x1b8] ss:$12 sps:$4 sm:$0xff]  }
  0x45   :  { %1198 = vmatprep.subr.bf16.mxu1 %v1305_v34  ;;  %v1340_v34 = vld [vmem:[#allocation5 + $0x1cc] ss:$12 sps:$4 sm:$0xff]  }
  0x47   :  { %899 = vmatpush1.bf16.msra.mxu0 %v1282_v33 }
  0x48   :  { %1199 = vmatpush3.bf16.msra.mxu1 %v1307_v36  ;;  %900 = vmatprep.subr.bf16.mxu0 %v1283_v35  ;;  %v1341_v35 = vld [vmem:[#allocation5 + $0x290] ss:$12 sps:$4 sm:$0xff]  }
  0x49   :  { %1200 = vmatprep.subr.bf16.mxu1 %v1310_v37  ;;  %v1338_v37 = vld [vmem:[#allocation5 + $0x1c8] ss:$12 sps:$4 sm:$0xff]  }
  0x4b   :  { %901 = vmatpush1.bf16.msra.mxu0 %v1286_v38  ;;  %v1342_v38 = vld [vmem:[#allocation5 + $0x1d0] ss:$12 sps:$4 sm:$0xff]  }
  0x4c   :  { %1201 = vmatpush3.bf16.msra.mxu1 %v1312_v40  ;;  %902 = vmatprep.subr.bf16.mxu0 %v1288_v39  ;;  %v1345_v39 = vld [vmem:[#allocation5 + $0x1e4] ss:$12 sps:$4 sm:$0xff]   ;;  %v1346_v40 = vld [vmem:[#allocation5 + $0x2a8] ss:$12 sps:$4 sm:$0xff]  }
  0x4d   :  { %1202 = vmatprep.subr.bf16.mxu1 %v1315_v51 }
  0x4f   :  { %903 = vmatpush1.bf16.msra.mxu0 %v1291_v41  ;;  %v1533_v41 = vsub.s32 2, %v71_v61  ;;  %v1363_v61 = vld [vmem:[#allocation5 + $0x240] ss:$12 sps:$4 sm:$0xff]  }
  0x50   :  { %904 = vmatprep.subr.bf16.mxu0 %v1293_v42  ;;  %1203 = vmatpush3.bf16.msra.mxu1 %v1317_v53  ;;  %v1343_v42 = vld [vmem:[#allocation5 + $0x1e0] ss:$12 sps:$4 sm:$0xff]   ;;  %v1357_v53 = vld [vmem:[#allocation5 + $0x218] ss:$12 sps:$4 sm:$0xff]  }
  0x51   :  { %1204 = vmatprep.subr.bf16.mxu1 %v1320_v55  ;;  %v1361_v55 = vld [vmem:[#allocation5 + $0x2f0] ss:$12 sps:$4 sm:$0xff]  }
  0x53   :  { %905 = vmatpush1.bf16.msra.mxu0 %v1296_v43  ;;  %v1347_v43 = vld [vmem:[#allocation5 + $0x1e8] ss:$12 sps:$4 sm:$0xff]  }
  0x54   :  { %906 = vmatprep.subr.bf16.mxu0 %v1298_v44  ;;  %1205 = vmatpush3.bf16.msra.mxu1 %v1322_v57  ;;  %v1350_v44 = vld [vmem:[#allocation5 + $0x1fc] ss:$12 sps:$4 sm:$0xff]  }
  0x55   :  { %1212 = vmatprep.subr.bf16.mxu1 %v1326_v59  ;;  %v1358_v57 = vld [vmem:[#allocation5 + $0x228] ss:$12 sps:$4 sm:$0xff]   ;;  %v1365_v59 = vld [vmem:[#allocation5 + $0x244] ss:$12 sps:$4 sm:$0xff]  }
  0x57   :  { %907 = vmatpush1.bf16.msra.mxu0 %v1301_v45  ;;  %v1351_v45 = vld [vmem:[#allocation5 + $0x2c0] ss:$12 sps:$4 sm:$0xff]  }
  0x58   :  { %908 = vmatprep.subr.bf16.mxu0 %v1303_v46  ;;  %v81_v46 = vrot.slane %v1521_v63, %v1533_v41  ;;  %v1368_v63 = vld [vmem:[#allocation5 + $0x25c] ss:$12 sps:$4 sm:$0xff]  }
  0x5b   :  { %909 = vmatpush1.bf16.msra.mxu0 %v1306_v47  ;;  %v1348_v47 = vld [vmem:[#allocation5 + $0x1f8] ss:$12 sps:$4 sm:$0xff]  }
  0x5c   :  { %910 = vmatprep.subr.bf16.mxu0 %v1308_v48  ;;  %v1352_v48 = vld [vmem:[#allocation5 + $0x200] ss:$12 sps:$4 sm:$0xff]  }
  0x5f   :  { %911 = vmatpush1.bf16.msra.mxu0 %v1311_v49  ;;  %v1355_v49 = vld [vmem:[#allocation5 + $0x214] ss:$12 sps:$4 sm:$0xff]  }
  0x60   :  { %912 = vmatprep.subr.bf16.mxu0 %v1313_v50  ;;  %v1356_v50 = vld [vmem:[#allocation5 + $0x2d8] ss:$12 sps:$4 sm:$0xff]  }
  0x63   :  { %913 = vmatpush1.bf16.msra.mxu0 %v1316_v52  ;;  %v1353_v52 = vld [vmem:[#allocation5 + $0x210] ss:$12 sps:$4 sm:$0xff]  }
  0x64   :  { %914 = vmatprep.subr.bf16.mxu0 %v1318_v54  ;;  %v1360_v54 = vld [vmem:[#allocation5 + $0x22c] ss:$12 sps:$4 sm:$0xff]  }
  0x67   :  { %915 = vmatpush1.bf16.msra.mxu0 %v1321_v56 }
  0x68   :  { %925 = vmatprep.subr.bf16.mxu0 %v1325_v58  ;;  %v1362_v58 = vld [vmem:[#allocation5 + $0x230] ss:$12 sps:$4 sm:$0xff]  }
 0x102   :  { %v168_v3 = vpop.f32.mrb[0].mxu1 }
 0x103   :  { %v169_v4 = vadd.f32 %v168_v3, %v73_v1  ;;  %v170_v5 = vpop.f32.mrb[1].mxu1  ;;  %v1366_v1 = vld [vmem:[#allocation5 + $0x258] ss:$12 sps:$4 sm:$0xff]   ;;  %v1369_v3 = vld [vmem:[#allocation5 + $0x270] ss:$12 sps:$4 sm:$0xff]  }
 0x104   :  { %v171_v6 = vadd.f32 %v170_v5, %v77_v2  ;;  %v172_v7 = vpop.f32.mrb[2].mxu1  ;;  %v1371_v2 = vld [vmem:[#allocation5 + $0x274] ss:$12 sps:$4 sm:$0xff]  }
 0x105   :  { %v216_v9 = vmax.f32 %v169_v4, 0.0  ;;  %v173_v10 = vpop.f32.mrb[3].mxu1  ;;  %v1374_v4 = vld [vmem:[#allocation5 + $0x28c] ss:$12 sps:$4 sm:$0xff]   ;;  %v1372_v5 = vld [vmem:[#allocation5 + $0x288] ss:$12 sps:$4 sm:$0xff]  }
 0x106   :  { %v217_v11 = vmax.f32 %v171_v6, 0.0  ;;  %v1377_v6 = vld [vmem:[#allocation5 + $0x2a4] ss:$12 sps:$4 sm:$0xff]   ;;  %v1375_v7 = vld [vmem:[#allocation5 + $0x2a0] ss:$12 sps:$4 sm:$0xff]  }
 0x107   :  { %v223_v16 = vpack.c.bf16 %v216_v9, %v216_v9  ;;  %v1378_v9 = vld [vmem:[#allocation5 + $0x2b8] ss:$12 sps:$4 sm:$0xff]   ;;  %v1383_v10 = vld [vmem:[#allocation5 + $0x2d4] ss:$12 sps:$4 sm:$0xff]  }
 0x108   :  { %v224_v12 = vpack.c.bf16 %v217_v11, %v217_v11  ;;  %v1381_v11 = vld [vmem:[#allocation5 + $0x2d0] ss:$12 sps:$4 sm:$0xff]  }
 0x10a   :  { %916 = vmatprep.mubr.bf16.mxu0 %v224_v12  ;;  %998 = vmatprep.mubr.bf16.mxu1 %v224_v12  ;;  %v209_v20 = vpop.f32.mrb[4].mxu1  ;;  %v1386_v12 = vld [vmem:[#allocation5 + $0x2ec] ss:$12 sps:$4 sm:$0xff]  }
 0x10b   :  { %917 = vmatmul.mubr.bf16.vlgmr.msra.gmra.mrb[0].mxu0 %v223_v16  ;;  %999 = vmatmul.mubr.bf16.vlgmr.msra.gmra.mrb[8].mxu1 %v223_v16  ;;  %v211_v21 = vpop.f32.mrb[5].mxu1  ;;  %v210_v51 = vadd.f32 %v209_v20, %v81_v46  ;;  %v368_v20 = vrot.slane %v355_v19, %v1533_v41 }
 0x10c   :  { %926 = vmatpush1.bf16.msra.mxu0 %v1323_v13  ;;  %1213 = vmatpush3.bf16.msra.mxu1 %v1327_v14  ;;  %v212_v24 = vadd.f32 %v211_v21, %v85_v15  ;;  %v213_v26 = vpop.f32.mrb[6].mxu1  ;;  %v1384_v13 = vld [vmem:[#allocation5 + $0x2e8] ss:$12 sps:$4 sm:$0xff]  }
 0x10d   :  { %927 = vmatprep.subr.bf16.mxu0 %v1330_v17  ;;  %1214 = vmatprep.subr.bf16.mxu1 %v1331_v18  ;;  %v214_v29 = vpop.f32.mrb[7].mxu1  ;;  %v218_v56 = vmax.f32 %v210_v51, 0.0 }
 0x10e   :  { %v219_v30 = vmax.f32 %v212_v24, 0.0  ;;  %v364_v29 = vrot.slane %v355_v19, %v1523_v0 }
 0x10f   :  { %v225_v60 = vpack.c.bf16 %v218_v56, %v218_v56 }
 0x110   :  { %928 = vmatpush1.bf16.msra.mxu0 %v1328_v22  ;;  %1215 = vmatpush3.bf16.msra.mxu1 %v1332_v23  ;;  %v222_v33 = vadd.f32 %v221_v25, %v219_v30 }
 0x111   :  { %929 = vmatprep.subr.bf16.mxu0 %v1335_v27  ;;  %1216 = vmatprep.subr.bf16.mxu1 %v1336_v28  ;;  %v360_v28 = vrot.slane %v355_v19, %v1516_v62 }
 0x112   :  { %v226_v36 = vpack.c.bf16 %v222_v33, %v222_v33 }
 0x114   :  { %930 = vmatpush1.bf16.msra.mxu0 %v1333_v31  ;;  %1217 = vmatpush3.bf16.msra.mxu1 %v1337_v32  ;;  %v1049_v31 = vld [vmem:[%s1561_s6] sm:$0x7] }
 0x115   :  { %931 = vmatprep.subr.bf16.mxu0 %v1340_v34  ;;  %1218 = vmatprep.subr.bf16.mxu1 %v1341_v35  ;;  %v1054_v33 = vrot.slane %v1049_v31, %v1516_v62  ;;  %v1074_v62 = vstv %s1562_s7 }
 0x116   :  { %1038 = vmatprep.mubr.bf16.mxu1 %v226_v36  ;;  %957 = vmatprep.mubr.bf16.mxu0 %v226_v36  ;;  %v1058_v36 = vrot.slane %v1049_v31, %v1523_v0 }
 0x118   :  { %932 = vmatpush1.bf16.msra.mxu0 %v1338_v37  ;;  %1219 = vmatpush3.bf16.msra.mxu1 %v1342_v38 }
 0x119   :  { %933 = vmatprep.subr.bf16.mxu0 %v1345_v39  ;;  %1220 = vmatprep.subr.bf16.mxu1 %v1346_v40 }
 0x11c   :  { %934 = vmatpush1.bf16.msra.mxu0 %v1343_v42  ;;  %1221 = vmatpush3.bf16.msra.mxu1 %v1347_v43  ;;  %v1062_v43 = vrot.slane %v1049_v31, %v1533_v41 }
 0x11d   :  { %935 = vmatprep.subr.bf16.mxu0 %v1350_v44  ;;  %1222 = vmatprep.subr.bf16.mxu1 %v1351_v45 }
 0x120   :  { %936 = vmatpush1.bf16.msra.mxu0 %v1348_v47  ;;  %1223 = vmatpush3.bf16.msra.mxu1 %v1352_v48 }
 0x121   :  { %937 = vmatprep.subr.bf16.mxu0 %v1355_v49  ;;  %1224 = vmatprep.subr.bf16.mxu1 %v1356_v50 }
 0x124   :  { %938 = vmatpush1.bf16.msra.mxu0 %v1353_v52  ;;  %1225 = vmatpush3.bf16.msra.mxu1 %v1357_v53 }
 0x125   :  { %939 = vmatprep.subr.bf16.mxu0 %v1360_v54  ;;  %1226 = vmatprep.subr.bf16.mxu1 %v1361_v55 }
 0x128   :  { %940 = vmatpush1.bf16.msra.mxu0 %v1358_v57  ;;  %1227 = vmatpush3.bf16.msra.mxu1 %v1362_v58 }
 0x129   :  { %941 = vmatprep.subr.bf16.mxu0 %v1365_v59 }
 0x12b   :  { %1039 = vmatmul.mubr.bf16.vlgmr.msra.gmra.mrb[12].mxu1 %v225_v60 }
 0x12c   :  { %942 = vmatpush1.bf16.msra.mxu0 %v1363_v61 }
 0x12d   :  { %943 = vmatprep.subr.bf16.mxu0 %v1368_v63 }
 0x130   :  { %944 = vmatpush1.bf16.msra.mxu0 %v1366_v1 }
 0x131   :  { %945 = vmatprep.subr.bf16.mxu0 %v1371_v2 }
 0x134   :  { %946 = vmatpush1.bf16.msra.mxu0 %v1369_v3 }
 0x135   :  { %947 = vmatprep.subr.bf16.mxu0 %v1374_v4 }
 0x138   :  { %948 = vmatpush1.bf16.msra.mxu0 %v1372_v5 }
 0x139   :  { %949 = vmatprep.subr.bf16.mxu0 %v1377_v6 }
 0x13c   :  { %950 = vmatpush1.bf16.msra.mxu0 %v1375_v7 }
 0x13d   :  { %951 = vmatprep.subr.bf16.mxu0 %v1380_v8 }
 0x140   :  { %952 = vmatpush1.bf16.msra.mxu0 %v1378_v9 }
 0x141   :  { %953 = vmatprep.subr.bf16.mxu0 %v1383_v10 }
 0x144   :  { %954 = vmatpush1.bf16.msra.mxu0 %v1381_v11 }
 0x145   :  { %955 = vmatprep.subr.bf16.mxu0 %v1386_v12 }
 0x148   :  { %956 = vmatpush1.bf16.msra.mxu0 %v1384_v13 }
 0x14b   :  { %958 = vmatmul.mubr.bf16.vlgmr.msra.gmra.mrb[0].mxu0 %v225_v60 }
 0x1de   :  { %v1206_v14 = vpop.f32.mrb[8].mxu1 }
 0x1df   :  { %v1207_v15 = vpop.f32.mrb[9].mxu1 }
 0x1e0   :  { %v1208_v16 = vadd.f32 %v1207_v15, %v1206_v14  ;;  %v1209_v17 = vpop.f32.mrb[10].mxu1 }
 0x1e1   :  { %v1210_v18 = vpop.f32.mrb[11].mxu1 }
 0x1e2   :  { %v1001_v23 = vadd.f32 %v1208_v16, %v368_v20 }
 0x1fe   :  { %v1228_v21 = vpop.f32.mrb[12].mxu1 }
 0x1ff   :  { %v1229_v22 = vpop.f32.mrb[13].mxu1 }
 0x200   :  { %v1230_v24 = vadd.f32 %v1229_v22, %v1228_v21  ;;  %v1231_v25 = vpop.f32.mrb[14].mxu1 }
 0x201   :  { %v1232_v26 = vpop.f32.mrb[15].mxu1 }
 0x202   :  { %v1041_v27 = vadd.f32 %v1230_v24, %v1001_v23 }
 0x204   :  { %v1048_v40 = vmax.f32 %v1041_v27, 0.0 }
 0x206   :  { %v1068_v46 = vmul.f32 %v1062_v43, %v1048_v40 }
 0x21e   :  { %v959_v30 = vpop.f32.mrb[0].mxu0 }
 0x21f   :  { %v1234_v32 = vadd.f32 %v959_v30, %v360_v28  ;;  %v961_v34 = vpop.f32.mrb[1].mxu0 }
 0x220   :  { %v1235_v35 = vadd.f32 %v961_v34, %v364_v29  ;;  %v963_v37 = vpop.f32.mrb[2].mxu0 }
 0x221   :  { %v1046_v38 = vmax.f32 %v1234_v32, 0.0  ;;  %v964_v39 = vpop.f32.mrb[3].mxu0 }
 0x222   :  { %v1047_v42 = vmax.f32 %v1235_v35, 0.0 }
 0x223   :  { %v1066_v44 = vmul.f32 %v1054_v33, %v1046_v38 }
 0x224   :  { %v1067_v45 = vmul.f32 %v1058_v36, %v1047_v42 }
 0x226   :  { %v1069_v47 = vadd.f32 %v1067_v45, %v1066_v44 }
 0x228   :  { %v1070_v48 = vadd.f32 %v1069_v47, %v1068_v46 }
 0x22a   :  { %1071 = vadd.xlane.f32.xlu0 %v1070_v48 }
 0x2b7   :  { %v1072_v49 = vpop.xlane.xlu0 %1071 }
 0x2b8   :  { %v1075_v0 = vadd.f32 %v1074_v62, %v1072_v49 }
 0x2ba   :  { %1077 = vst.msk [vmem:[%s1563_s8] sm:$0xff] %vm1076_vm1, %v1075_v0 }
 0x2bb   :  { %1082 = vsyncpa [#allocation4], 1 }
 0x2bc   :  { %1083 = vsyncpa [#allocation6], 1 }

</bundles_post_ra>
